<compile_context>
chip_gen: v6e
topology: v6e:2x2x1
jax: 0.10.0
libtpu: 0.0.40
codegen_flags: <defaults>
</compile_context>

<pallas_src>
import math
from functools import lru_cache

import numpy as np
import jax
import jax.numpy as jnp
from jax.experimental import pallas as pl
from jax.experimental.pallas import tpu as pltpu

LAMBDA_NOOBJ = 1.0
LAMBDA_OBJ = 10.0
LAMBDA_COORD = 1.0
IGNORE_THRES = 0.5
STRIDES = [8, 16, 32]


# ----------------------------------------------------------------------------
# host-side (numpy) helpers — faithful port of the reference bboxes_iou /
# build_target (data-dependent control flow; the reference runs it on CPU too)
# ----------------------------------------------------------------------------
def bboxes_iou_np(bboxes_a, bboxes_b, xyxy=True, GIoU=False, DIoU=False, CIoU=False):
    if bboxes_a.shape[1] != 4 or bboxes_b.shape[1] != 4:
        raise IndexError
    if xyxy:
        tl = np.maximum(bboxes_a[:, None, :2], bboxes_b[:, :2])
        br = np.minimum(bboxes_a[:, None, 2:], bboxes_b[:, 2:])
        con_tl = np.minimum(bboxes_a[:, None, :2], bboxes_b[:, :2])
        con_br = np.maximum(bboxes_a[:, None, 2:], bboxes_b[:, 2:])
        rho2 = (bboxes_a[:, None, 0] + bboxes_a[:, None, 2]
                - (bboxes_b[:, 0] + bboxes_b[:, 2])) ** 2 / 4 \
             + (bboxes_a[:, None, 1] + bboxes_a[:, None, 3]
                - (bboxes_b[:, 1] + bboxes_b[:, 3])) ** 2 / 4
        w1 = bboxes_a[:, 2] - bboxes_a[:, 0]
        h1 = bboxes_a[:, 3] - bboxes_a[:, 1]
        w2 = bboxes_b[:, 2] - bboxes_b[:, 0]
        h2 = bboxes_b[:, 3] - bboxes_b[:, 1]
        area_a = np.prod(bboxes_a[:, 2:] - bboxes_a[:, :2], 1)
        area_b = np.prod(bboxes_b[:, 2:] - bboxes_b[:, :2], 1)
    else:
        tl = np.maximum(bboxes_a[:, None, :2] - bboxes_a[:, None, 2:] / 2,
                        bboxes_b[:, :2] - bboxes_b[:, 2:] / 2)
        br = np.minimum(bboxes_a[:, None, :2] + bboxes_a[:, None, 2:] / 2,
                        bboxes_b[:, :2] + bboxes_b[:, 2:] / 2)
        con_tl = np.minimum(bboxes_a[:, None, :2] - bboxes_a[:, None, 2:] / 2,
                            bboxes_b[:, :2] - bboxes_b[:, 2:] / 2)
        con_br = np.maximum(bboxes_a[:, None, :2] + bboxes_a[:, None, 2:] / 2,
                            bboxes_b[:, :2] + bboxes_b[:, 2:] / 2)
        rho2 = ((bboxes_a[:, None, :2] - bboxes_b[:, :2]) ** 2 / 4).sum(axis=-1)
        w1 = bboxes_a[:, 2]
        h1 = bboxes_a[:, 3]
        w2 = bboxes_b[:, 2]
        h2 = bboxes_b[:, 3]
        area_a = np.prod(bboxes_a[:, 2:], 1)
        area_b = np.prod(bboxes_b[:, 2:], 1)
    en = (tl < br).astype(tl.dtype).prod(axis=2)
    area_i = np.prod(br - tl, 2) * en
    area_u = area_a[:, None] + area_b - area_i
    iou = area_i / area_u
    if GIoU or DIoU or CIoU:
        if GIoU:
            area_c = np.prod(con_br - con_tl, 2)
            return iou - (area_c - area_u) / area_c
        if DIoU or CIoU:
            c2 = ((con_br - con_tl) ** 2).sum(axis=2) + 1e-16
            if DIoU:
                return iou - rho2 / c2
            elif CIoU:
                v = 4 / math.pi ** 2 * (np.arctan(w1 / h1)[:, None] - np.arctan(w2 / h2)) ** 2
                alpha = v / (1 - iou + v)
                return iou - (rho2 / c2 + v * alpha)
    return iou


class YoloLossConfig:
    def __init__(self, num_classes, batch_size, all_anchors, anchor_masks,
                 img_size, num_anchors):
        self.num_classes = num_classes
        self.num_anchors = num_anchors
        self.anchors = all_anchors
        self.anchor_masks = anchor_masks
        self.img_size = img_size
        self.strides = STRIDES
        self.ignore_thres = IGNORE_THRES
        self.masked_anchors, self.ref_anchors = [], []
        for i in range(3):
            all_anchors_grid = [(w / self.strides[i], h / self.strides[i])
                                for w, h in self.anchors]
            masked_anchors = np.array([all_anchors_grid[j] for j in anchor_masks[i]],
                                      dtype=np.float32)
            ref_anchors = np.zeros((len(all_anchors_grid), 4), dtype=np.float32)
            ref_anchors[:, 2:] = np.array(all_anchors_grid, dtype=np.float32)
            self.masked_anchors.append(masked_anchors)
            self.ref_anchors.append(ref_anchors)
        # grid_x / grid_y / anchor_w / anchor_h are derived analytically from
        # cell indices (no dense aux tensors are ever materialized).


def build_target_sparse(cfg, labels, batch_size, fsize, num_ch, output_id):
    """Label-only part of the reference build_target, returning a SPARSE
    representation: positive-cell flat indices + their target C-vectors,
    ignore-cell flat indices (conf_mask == 0), plus num_labels and the
    per-ground-truth positive-cell list used for num_correct."""
    A = cfg.num_anchors
    tgt_mask = np.zeros((batch_size, A, fsize, fsize), np.float32)
    conf_mask = np.ones((batch_size, A, fsize, fsize), np.float32)
    cell_targets = {}   # flat (b,a,j,i) index -> (num_ch,) target vector
    stride = cfg.strides[output_id]
    truth_x_all = (labels[:, :, 2] + labels[:, :, 0]) / (stride * 2)
    truth_y_all = (labels[:, :, 3] + labels[:, :, 1]) / (stride * 2)
    truth_w_all = (labels[:, :, 2] - labels[:, :, 0]) / stride
    truth_h_all = (labels[:, :, 3] - labels[:, :, 1]) / stride
    truth_i_all = truth_x_all.astype(np.int16)
    truth_j_all = truth_y_all.astype(np.int16)
    num_labels_total = (labels.sum(axis=2) > 0).sum(axis=1)
    num_labels = 0
    pos_cells = []   # (flat_index, truth_box(4,), t_cls) — one entry per matched GT
    for b in range(batch_size):
        n = int(num_labels_total[b])
        if n == 0:
            continue
        truth_box = np.zeros((n, 4), np.float32)
        truth_box[:n, 2] = truth_w_all[b, :n]
        truth_box[:n, 3] = truth_h_all[b, :n]
        truth_i = truth_i_all[b, :n]
        truth_j = truth_j_all[b, :n]
        anchor_ious_all = bboxes_iou_np(truth_box, cfg.ref_anchors[output_id],
                                        xyxy=True, CIoU=True)
        mask_begin = cfg.anchor_masks[output_id][0]
        mask_end = cfg.anchor_masks[output_id][1] + 1
        anchor_ious_masked = anchor_ious_all[:, mask_begin:mask_end]
        best_n_all = anchor_ious_all.argmax(axis=1)
        best_n = best_n_all % int(len(cfg.anchors) / 3)
        best_n_mask = np.isin(best_n_all, np.array(cfg.anchor_masks[output_id]))
        num_labels += int(best_n_mask.sum())
        if num_labels == 0:
            continue
        truth_box[:n, 0] = truth_x_all[b, :n]
        truth_box[:n, 1] = truth_y_all[b, :n]
        for ti in range(best_n.shape[0]):
            if best_n_mask[ti]:
                i, j = int(truth_i[ti]), int(truth_j[ti])
                a = int(best_n[ti])
                # NOTE: the (i, j) order of the ignore scatter mirrors the
                # reference YOLOv4 code exactly (known quirk, kept on purpose).
                conf_mask[b, anchor_ious_masked[ti] > cfg.ignore_thres, i, j] = 0
                conf_mask[b, a, j, i] = 1
                tgt_mask[b, a, j, i] = 1
                flat = ((b * A + a) * fsize + j) * fsize + i
                vec = cell_targets.setdefault(flat, np.zeros(num_ch, np.float32))
                vec[0] = truth_x_all[b, ti] - float(np.int16(truth_x_all[b, ti]))
                vec[1] = truth_y_all[b, ti] - float(np.int16(truth_y_all[b, ti]))
                vec[2] = np.log(
                    truth_w_all[b, ti] / cfg.masked_anchors[output_id][a, 0] + 1e-16)
                vec[3] = np.log(
                    truth_h_all[b, ti] / cfg.masked_anchors[output_id][a, 1] + 1e-16)
                vec[4] = 1.0
                vec[5 + int(labels[b, ti, 4])] = 1.0
                pos_cells.append((flat, truth_box[ti].copy(), int(labels[b, ti, 4])))
    # invariant the kernel's float-XOR noobj mask and the sparse conf_mask
    # reconstruction (ones + ignore scatter) both rely on:
    assert np.all(conf_mask[tgt_mask > 0.5] == 1.0)
    if cell_targets:
        pos_flat = np.fromiter(cell_targets.keys(), dtype=np.int64)
        pos_vals = np.stack([cell_targets[int(k)] for k in pos_flat]).astype(np.float32)
    else:
        pos_flat = np.zeros((0,), np.int64)
        pos_vals = np.zeros((0, num_ch), np.float32)
    ign_flat = np.flatnonzero(conf_mask.reshape(-1) == 0).astype(np.int64)
    return pos_flat, pos_vals, ign_flat, num_labels, pos_cells


def count_correct(pos_cells, pred_cols):
    """num_correct of the reference, from decoded predictions gathered at the
    positive cells only (pred_cols: (C, K) numpy, columns follow pos_cells)."""
    num_correct = 0
    for k, (_, truth_box, t_cls) in enumerate(pos_cells):
        pred_box = pred_cols[:4, k].astype(np.float32)
        ciou = bboxes_iou_np(truth_box[None, :], pred_box[None, :],
                             xyxy=False, CIoU=True)
        obj_score = float(pred_cols[4, k])
        pred_cls = int(np.argmax(pred_cols[5:, k]))
        if float(ciou[0, 0]) > 0.5 and obj_score > 0.5 and pred_cls == t_cls:
            num_correct += 1
    return num_correct


# ----------------------------------------------------------------------------
# Pallas loss kernel
# ----------------------------------------------------------------------------
@lru_cache(maxsize=None)
def _vmem_limit_bytes():
    # generation-aware VMEM budget: ~48 MiB on v7x (64 MiB physical),
    # ~96 MiB on v5e/v6e (128 MiB physical), conservative fallback otherwise.
    try:
        cap = int(pltpu.get_tpu_info().vmem_capacity_bytes)
        return int(min((cap * 3) // 4, 96 * 1024 * 1024))
    except Exception:
        return 32 * 1024 * 1024


@lru_cache(maxsize=None)
def _get_loss_call(C, BA, HW, cores, vmem_limit):
    """Fused loss + num_proposals kernel.

    grid = (cores, BA // cores): the leading axis is "parallel" (split across
    the two TensorCores on v7x, a plain loop elsewhere); the trailing axis is
    the "arbitrary" reduction over the (C, HW) slabs.  Per step everything is
    element-wise, accumulated into an (8, HW) VMEM scratch; cross-lane
    reductions and the single packed output store happen only at the last
    step.  Blocks cover the full HW axis, so there is no lane padding and no
    validity mask is required.
    """
    ba_per_core = BA // cores

    def kernel(raw_ref, tgt_ref, msk_ref, out_ref, acc_ref):
        step = pl.program_id(1)

        @pl.when(step == 0)
        def _():
            acc_ref[...] = jnp.zeros_like(acc_ref)

        tm = msk_ref[0:1, :]        # tgt_mask row, values in {0, 1}
        cm = msk_ref[1:2, :]        # conf_mask row, values in {0, 1}
        # noobj = conf_mask XOR tgt_mask (build_target guarantees conf_mask==1
        # wherever tgt_mask==1, asserted on the host side)
        noobj = cm + tm - 2.0 * cm * tm

        # xy: masked squared error on the sigmoid activations (rows 0:2)
        d_xy = jax.nn.sigmoid(raw_ref[0:2, :]) - tgt_ref[0:2, :]
        acc_ref[0:2, :] += d_xy * d_xy * tm

        # wh: masked squared error on the raw logits (rows 2:4)
        d_wh = raw_ref[2:4, :] - tgt_ref[2:4, :]
        acc_ref[2:4, :] += d_wh * d_wh * tm

        # conf: clamped-log BCE (matches torch BCELoss on f32 sigmoid outputs;
        # the softplus/logits form would diverge once |logit| >~ 17), with the
        # obj/noobj sums merged into one weighted mask (disjoint supports).
        p_conf = jax.nn.sigmoid(raw_ref[4:5, :])
        t_conf = tgt_ref[4:5, :]
        bce_conf = -(t_conf * jnp.maximum(jnp.log(p_conf), -100.0)
                     + (1.0 - t_conf) * jnp.maximum(jnp.log(1.0 - p_conf), -100.0))
        acc_ref[4:5, :] += bce_conf * (LAMBDA_OBJ * tm + LAMBDA_NOOBJ * noobj)

        # num_proposals: every lane is a real cell (no padding), count directly
        acc_ref[5:6, :] += (p_conf > 0.5).astype(jnp.float32)

        # cls: clamped-log BCE on the class rows, masked by tgt_mask
        p_cls = jax.nn.sigmoid(raw_ref[5:, :])
        t_cls = tgt_ref[5:, :]
        bce_cls = -(t_cls * jnp.maximum(jnp.log(p_cls), -100.0)
                    + (1.0 - t_cls) * jnp.maximum(jnp.log(1.0 - p_cls), -100.0))
        acc_ref[6:7, :] += jnp.sum(bce_cls * tm, axis=0, keepdims=True)

        @pl.when(step == ba_per_core - 1)
        def _():
            # one lane reduction + one lane-dense packed store per core
            sums = jnp.sum(acc_ref[...], axis=1, keepdims=True)      # (8, 1)
            out_ref[...] = jnp.broadcast_to(sums[None, :, :], (1, 8, 128))

    return pl.pallas_call(
        kernel,
        out_shape=jax.ShapeDtypeStruct((cores, 8, 128), jnp.float32),
        grid=(cores, ba_per_core),
        in_specs=[
            pl.BlockSpec((pl.Squeezed(), C, HW),
                         lambda c, i: (c * ba_per_core + i, 0, 0)),   # raw
            pl.BlockSpec((pl.Squeezed(), C, HW),
                         lambda c, i: (c * ba_per_core + i, 0, 0)),   # target
            pl.BlockSpec((pl.Squeezed(), 2, HW),
                         lambda c, i: (c * ba_per_core + i, 0, 0)),   # masks
        ],
        out_specs=pl.BlockSpec((1, 8, 128), lambda c, i: (c, 0, 0)),
        scratch_shapes=[pltpu.VMEM((8, HW), jnp.float32)],
        compiler_params=pltpu.CompilerParams(
            dimension_semantics=("parallel", "arbitrary"),
            vmem_limit_bytes=vmem_limit),
    )


# ----------------------------------------------------------------------------
# forward (training path, eval=False)
# ----------------------------------------------------------------------------
def yolo_loss_forward(cfg, xin, labels_np):
    A = cfg.num_anchors
    C = 5 + cfg.num_classes
    vmem_limit = _vmem_limit_bytes()

    device_outs, host_meta = [], []
    for output_id, output in enumerate(xin):
        B = int(output.shape[0])
        F = int(output.shape[2])
        BA, HW = B * A, F * F

        # free, contiguous reshape NCHW (B, A*C, F, F) -> (B*A, C, F*F); no
        # transpose, no padding, no dtype round-trip through HBM.
        raw3 = jnp.reshape(output, (BA, C, HW))
        if raw3.dtype != jnp.float32:
            raw3 = raw3.astype(jnp.float32)

        # host: label-only target build -> sparse cell lists (tiny transfer)
        pos_flat, pos_vals, ign_flat, num_labels, pos_cells = build_target_sparse(
            cfg, labels_np, B, F, C, output_id)
        K = int(pos_flat.shape[0])

        # device: rebuild the dense target / mask slabs from the sparse lists
        if K > 0:
            ba_p = (pos_flat // HW).astype(np.int32)
            hw_p = (pos_flat % HW).astype(np.int32)
            base = pos_flat.astype(np.int64) * C - ba_p.astype(np.int64) * (C - 1) * HW
            tgt_idx = (ba_p.astype(np.int64) * (C * HW) + hw_p)[:, None] \
                      + (np.arange(C, dtype=np.int64) * HW)[None, :]
            target3 = (jnp.zeros((BA * C * HW,), jnp.float32)
                       .at[jnp.asarray(tgt_idx.reshape(-1).astype(np.int32))]
                       .set(jnp.asarray(pos_vals.reshape(-1)))
                       .reshape(BA, C, HW))
        else:
            target3 = jnp.zeros((BA, C, HW), jnp.float32)

        # masks3: row 0 = tgt_mask (base 0), row 1 = conf_mask (base 1)
        masks3 = jnp.zeros((BA, 2, HW), jnp.float32).at[:, 1, :].set(1.0)
        if K > 0:
            masks3 = masks3.at[jnp.asarray(ba_p), 0, jnp.asarray(hw_p)].set(1.0)
        if ign_flat.size > 0:
            ba_g = jnp.asarray((ign_flat // HW).astype(np.int32))
            hw_g = jnp.asarray((ign_flat % HW).astype(np.int32))
            masks3 = masks3.at[ba_g, 1, hw_g].set(0.0)

        # split the reduction across the two v7x TensorCores when possible
        cores = 2 if (BA % 2 == 0 and BA >= 2) else 1
        loss_call = _get_loss_call(C, BA, HW, cores, vmem_limit)
        packed = loss_call(raw3, target3, masks3)      # (cores, 8, 128)

        # K decoded prediction columns for num_correct only (tiny jnp gather;
        # the full prediction tensor is never materialized)
        pred_cols = None
        if pos_cells:
            flat_all = np.array([p[0] for p in pos_cells], np.int64)
            ba_i = (flat_all // HW).astype(np.int32)
            hw_i = (flat_all % HW).astype(np.int32)
            a_i = ba_i % A
            gx = (hw_i % F).astype(np.float32)
            gy = (hw_i // F).astype(np.float32)
            aw = cfg.masked_anchors[output_id][a_i, 0]
            ah = cfg.masked_anchors[output_id][a_i, 1]
            g = raw3[jnp.asarray(ba_i), :, jnp.asarray(hw_i)]       # (K', C)
            px = jax.nn.sigmoid(g[:, 0]) + jnp.asarray(gx)
            py = jax.nn.sigmoid(g[:, 1]) + jnp.asarray(gy)
            pw = jnp.exp(g[:, 2]) * jnp.asarray(aw)
            ph = jnp.exp(g[:, 3]) * jnp.asarray(ah)
            rest = jax.nn.sigmoid(g[:, 4:])
            pred_cols = jnp.concatenate(
                [px[:, None], py[:, None], pw[:, None], ph[:, None], rest], axis=1).T

        device_outs.append((packed, pred_cols))
        host_meta.append((num_labels, pos_cells))

    # single device sync for everything dispatched above
    jax.block_until_ready([x for tup in device_outs for x in tup if x is not None])

    loss_xy = loss_wh = loss_conf = loss_cls = 0.0
    num_labels_total = num_proposals_total = num_correct_total = 0
    for output_id, (packed, pred_cols) in enumerate(device_outs):
        num_labels, pos_cells = host_meta[output_id]
        r = np.asarray(packed).sum(axis=0)[:, 0]       # (8,) partials over cores
        loss_xy += LAMBDA_COORD * float(r[0] + r[1])
        loss_wh += LAMBDA_COORD * float(r[2] + r[3])
        loss_conf += float(r[4])
        loss_cls += float(r[6])
        num_proposals_total += int(round(float(r[5])))
        num_labels_total += num_labels
        if pos_cells:
            num_correct_total += count_correct(pos_cells, np.asarray(pred_cols))

    loss = loss_xy + loss_wh + loss_conf + loss_cls
    return (float(loss), float(loss_xy), float(loss_wh), float(loss_conf),
            float(loss_cls), num_labels_total, num_proposals_total,
            num_correct_total)


# ----------------------------------------------------------------------------
# pure-numpy reference for the dense loss terms (parity check)
# ----------------------------------------------------------------------------
def _reference_losses_np(cfg, xin_np, labels_np):
    A = cfg.num_anchors
    C = 5 + cfg.num_classes
    lxy = lwh = lconf = lcls = 0.0
    nprop = 0
    for oid, out in enumerate(xin_np):
        B, F = out.shape[0], out.shape[2]
        BA, HW = B * A, F * F
        raw = out.reshape(BA, C, HW).astype(np.float64)
        pos_flat, pos_vals, ign_flat, _, _ = build_target_sparse(
            cfg, labels_np, B, F, C, oid)
        tm = np.zeros(BA * HW)
        cm = np.ones(BA * HW)
        tgt = np.zeros((BA, C, HW))
        if pos_flat.size:
            tm[pos_flat] = 1.0
            tgt[pos_flat // HW, :, pos_flat % HW] = pos_vals
        if ign_flat.size:
            cm[ign_flat] = 0.0
        tm3 = tm.reshape(BA, 1, HW)
        cm3 = cm.reshape(BA, 1, HW)
        noobj3 = cm3 + tm3 - 2.0 * cm3 * tm3
        sig = 1.0 / (1.0 + np.exp(-raw))

        def bce(p, t):
            return -(t * np.maximum(np.log(p), -100.0)
                     + (1.0 - t) * np.maximum(np.log(1.0 - p), -100.0))

        lxy += LAMBDA_COORD * float(np.sum(((sig[:, 0:2] - tgt[:, 0:2]) ** 2) * tm3))
        lwh += LAMBDA_COORD * float(np.sum(((raw[:, 2:4] - tgt[:, 2:4]) ** 2) * tm3))
        lconf += float(np.sum(bce(sig[:, 4:5], tgt[:, 4:5])
                              * (LAMBDA_OBJ * tm3 + LAMBDA_NOOBJ * noobj3)))
        lcls += float(np.sum(bce(sig[:, 5:], tgt[:, 5:]) * tm3))
        nprop += int(np.sum(sig[:, 4, :] > 0.5))
    return lxy, lwh, lconf, lcls, nprop


if __name__ == "__main__":
    # small deterministic setup: img_size=64 -> fsizes 8 / 4 / 2
    num_classes = 3
    batch_size = 2
    num_anchors = 2                               # anchors per scale
    img_size = 64
    all_anchors = [(6.0, 8.0), (12.0, 16.0), (18.0, 24.0),
                   (28.0, 32.0), (40.0, 48.0), (56.0, 60.0)]
    anchor_masks = [[0, 1], [2, 3], [4, 5]]
    num_ch = 5 + num_classes

    cfg = YoloLossConfig(num_classes, batch_size, all_anchors, anchor_masks,
                         img_size, num_anchors)

    key = jax.random.PRNGKey(0)
    keys = jax.random.split(key, 3)
    xin = []
    for s, k in zip(STRIDES, keys):
        fsize = img_size // s
        xin.append(jax.random.normal(
            k, (batch_size, num_anchors * num_ch, fsize, fsize), dtype=jnp.float32))

    # labels: (B, max_labels, 5) = [x1, y1, x2, y2, cls] in image coords,
    # zero-padded rows at the end
    labels_np = np.zeros((batch_size, 3, 5), dtype=np.float32)
    labels_np[0, 0] = [4.0, 6.0, 28.0, 40.0, 1.0]
    labels_np[0, 1] = [34.0, 10.0, 60.0, 50.0, 0.0]
    labels_np[1, 0] = [10.0, 12.0, 50.0, 56.0, 2.0]

    result = yolo_loss_forward(cfg, xin, labels_np)
    jax.block_until_ready(result if hasattr(result, "block_until_ready") else jnp.zeros(()))
    (loss, lxy, lwh, lconf, lcls, n_lbl, n_prop, n_corr) = result
    assert np.isfinite(loss)

    # parity check against a pure-numpy reference of the dense loss terms
    ref_xy, ref_wh, ref_conf, ref_cls, ref_nprop = _reference_losses_np(
        cfg, [np.asarray(x) for x in xin], labels_np)
    np.testing.assert_allclose([lxy, lwh, lconf, lcls],
                               [ref_xy, ref_wh, ref_conf, ref_cls],
                               rtol=2e-3, atol=1e-3)
    assert n_prop == ref_nprop

    print("KERNEL_OK")
</pallas_src>

<mosaic_0001>
module attributes {stable_mosaic.version = 11 : i64} {
  func.func @kernel(%arg0: i32, %arg1: i32, %arg2: memref<1x8x64xf32, #tpu.memory_space<vmem>>, %arg3: memref<1x8x64xf32, #tpu.memory_space<vmem>>, %arg4: memref<1x2x64xf32, #tpu.memory_space<vmem>>, %arg5: memref<1x8x128xf32, #tpu.memory_space<vmem>>, %arg6: memref<8x64xf32, #tpu.memory_space<vmem>>) attributes {dimension_semantics = [#tpu.dimension_semantics<parallel>, #tpu.dimension_semantics<arbitrary>], iteration_bounds = array<i64: 2, 2>, scalar_prefetch = 0 : i64, scratch_operands = 1 : i64, tpu.core_type = #tpu.core_type<tc>, window_params = [{transform_indices = @transform_0, window_bounds = array<i64: 1, 8, 64>}, {transform_indices = @transform_1, window_bounds = array<i64: 1, 8, 64>}, {transform_indices = @transform_2, window_bounds = array<i64: 1, 2, 64>}, {transform_indices = @transform_3, window_bounds = array<i64: 1, 8, 128>}]} {
    %c0_i32 = arith.constant 0 : i32
    %0 = arith.cmpi eq, %arg1, %c0_i32 : i32
    %1 = arith.extui %0 : i1 to i32
    %c0_i32_0 = arith.constant 0 : i32
    %2 = arith.cmpi ne, %1, %c0_i32_0 : i32
    scf.if %2 {
      %cst_63 = arith.constant 0.000000e+00 : f32
      %113 = vector.broadcast %cst_63 : f32 to vector<8x64xf32>
      %c0_64 = arith.constant 0 : index
      %c0_65 = arith.constant 0 : index
      %114 = vector.load %arg6[%c0_64, %c0_65] : memref<8x64xf32, #tpu.memory_space<vmem>>, vector<8x64xf32>
      tpu.vector_store %arg6[%c0_64, %c0_65], %113 {strides = array<i32>} : memref<8x64xf32, #tpu.memory_space<vmem>>, vector<8x64xf32>,
    } else {
    }
    %c0 = arith.constant 0 : index
    %c0_1 = arith.constant 0 : index
    %c0_2 = arith.constant 0 : index
    %3 = vector.load %arg4[%c0, %c0_1, %c0_2] : memref<1x2x64xf32, #tpu.memory_space<vmem>>, vector<1x1x64xf32>
    %4 = vector.shape_cast %3 : vector<1x1x64xf32> to vector<1x64xf32>
    %c0_3 = arith.constant 0 : index
    %c1 = arith.constant 1 : index
    %c0_4 = arith.constant 0 : index
    %5 = vector.load %arg4[%c0_3, %c1, %c0_4] : memref<1x2x64xf32, #tpu.memory_space<vmem>>, vector<1x1x64xf32>
    %6 = vector.shape_cast %5 : vector<1x1x64xf32> to vector<1x64xf32>
    %7 = arith.addf %6, %4 : vector<1x64xf32>
    %cst = arith.constant 2.000000e+00 : f32
    %8 = vector.broadcast %cst : f32 to vector<1x64xf32>
    %9 = arith.mulf %8, %6 : vector<1x64xf32>
    %10 = arith.mulf %9, %4 : vector<1x64xf32>
    %11 = arith.subf %7, %10 : vector<1x64xf32>
    %c0_5 = arith.constant 0 : index
    %c0_6 = arith.constant 0 : index
    %c0_7 = arith.constant 0 : index
    %12 = vector.load %arg2[%c0_5, %c0_6, %c0_7] : memref<1x8x64xf32, #tpu.memory_space<vmem>>, vector<1x2x64xf32>
    %13 = vector.shape_cast %12 : vector<1x2x64xf32> to vector<2x64xf32>
    %14 = arith.negf %13 : vector<2x64xf32>
    %15 = math.exp %14 : vector<2x64xf32>
    %cst_8 = arith.constant 1.000000e+00 : f32
    %16 = vector.broadcast %cst_8 : f32 to vector<2x64xf32>
    %17 = arith.addf %16, %15 : vector<2x64xf32>
    %18 = arith.divf %16, %17 : vector<2x64xf32>
    %c0_9 = arith.constant 0 : index
    %c0_10 = arith.constant 0 : index
    %c0_11 = arith.constant 0 : index
    %19 = vector.load %arg3[%c0_9, %c0_10, %c0_11] : memref<1x8x64xf32, #tpu.memory_space<vmem>>, vector<1x2x64xf32>
    %20 = vector.shape_cast %19 : vector<1x2x64xf32> to vector<2x64xf32>
    %21 = arith.subf %18, %20 : vector<2x64xf32>
    %c0_12 = arith.constant 0 : index
    %c0_13 = arith.constant 0 : index
    %22 = vector.load %arg6[%c0_12, %c0_13] : memref<8x64xf32, #tpu.memory_space<vmem>>, vector<2x64xf32>
    %23 = arith.mulf %21, %21 : vector<2x64xf32>
    %24 = vector.broadcast %4 : vector<1x64xf32> to vector<2x64xf32>
    %25 = arith.mulf %23, %24 : vector<2x64xf32>
    %26 = arith.addf %22, %25 : vector<2x64xf32>
    %c0_14 = arith.constant 0 : index
    %c0_15 = arith.constant 0 : index
    %27 = vector.load %arg6[%c0_14, %c0_15] : memref<8x64xf32, #tpu.memory_space<vmem>>, vector<2x64xf32>
    tpu.vector_store %arg6[%c0_14, %c0_15], %26 {strides = array<i32>} : memref<8x64xf32, #tpu.memory_space<vmem>>, vector<2x64xf32>,
    %c0_16 = arith.constant 0 : index
    %c2 = arith.constant 2 : index
    %c0_17 = arith.constant 0 : index
    %28 = vector.load %arg2[%c0_16, %c2, %c0_17] : memref<1x8x64xf32, #tpu.memory_space<vmem>>, vector<1x2x64xf32>
    %29 = vector.shape_cast %28 : vector<1x2x64xf32> to vector<2x64xf32>
    %c0_18 = arith.constant 0 : index
    %c2_19 = arith.constant 2 : index
    %c0_20 = arith.constant 0 : index
    %30 = vector.load %arg3[%c0_18, %c2_19, %c0_20] : memref<1x8x64xf32, #tpu.memory_space<vmem>>, vector<1x2x64xf32>
    %31 = vector.shape_cast %30 : vector<1x2x64xf32> to vector<2x64xf32>
    %32 = arith.subf %29, %31 : vector<2x64xf32>
    %c2_21 = arith.constant 2 : index
    %c0_22 = arith.constant 0 : index
    %33 = vector.load %arg6[%c2_21, %c0_22] : memref<8x64xf32, #tpu.memory_space<vmem>>, vector<2x64xf32>
    %34 = arith.mulf %32, %32 : vector<2x64xf32>
    %35 = vector.broadcast %4 : vector<1x64xf32> to vector<2x64xf32>
    %36 = arith.mulf %34, %35 : vector<2x64xf32>
    %37 = arith.addf %33, %36 : vector<2x64xf32>
    %c2_23 = arith.constant 2 : index
    %c0_24 = arith.constant 0 : index
    %38 = vector.load %arg6[%c2_23, %c0_24] : memref<8x64xf32, #tpu.memory_space<vmem>>, vector<2x64xf32>
    tpu.vector_store %arg6[%c2_23, %c0_24], %37 {strides = array<i32>} : memref<8x64xf32, #tpu.memory_space<vmem>>, vector<2x64xf32>,
    %c0_25 = arith.constant 0 : index
    %c4 = arith.constant 4 : index
    %c0_26 = arith.constant 0 : index
    %39 = vector.load %arg2[%c0_25, %c4, %c0_26] : memref<1x8x64xf32, #tpu.memory_space<vmem>>, vector<1x1x64xf32>
    %40 = vector.shape_cast %39 : vector<1x1x64xf32> to vector<1x64xf32>
    %41 = arith.negf %40 : vector<1x64xf32>
    %42 = math.exp %41 : vector<1x64xf32>
    %cst_27 = arith.constant 1.000000e+00 : f32
    %43 = vector.broadcast %cst_27 : f32 to vector<1x64xf32>
    %44 = arith.addf %43, %42 : vector<1x64xf32>
    %45 = arith.divf %43, %44 : vector<1x64xf32>
    %c0_28 = arith.constant 0 : index
    %c4_29 = arith.constant 4 : index
    %c0_30 = arith.constant 0 : index
    %46 = vector.load %arg3[%c0_28, %c4_29, %c0_30] : memref<1x8x64xf32, #tpu.memory_space<vmem>>, vector<1x1x64xf32>
    %47 = vector.shape_cast %46 : vector<1x1x64xf32> to vector<1x64xf32>
    %48 = math.log %45 : vector<1x64xf32>
    %cst_31 = arith.constant -1.000000e+02 : f32
    %49 = vector.broadcast %cst_31 : f32 to vector<1x64xf32>
    %50 = arith.maximumf %48, %49 : vector<1x64xf32>
    %51 = arith.mulf %47, %50 : vector<1x64xf32>
    %cst_32 = arith.constant 1.000000e+00 : f32
    %52 = vector.broadcast %cst_32 : f32 to vector<1x64xf32>
    %53 = arith.subf %52, %47 : vector<1x64xf32>
    %cst_33 = arith.constant 1.000000e+00 : f32
    %54 = vector.broadcast %cst_33 : f32 to vector<1x64xf32>
    %55 = arith.subf %54, %45 : vector<1x64xf32>
    %56 = math.log %55 : vector<1x64xf32>
    %cst_34 = arith.constant -1.000000e+02 : f32
    %57 = vector.broadcast %cst_34 : f32 to vector<1x64xf32>
    %58 = arith.maximumf %56, %57 : vector<1x64xf32>
    %59 = arith.mulf %53, %58 : vector<1x64xf32>
    %60 = arith.addf %51, %59 : vector<1x64xf32>
    %cst_35 = arith.constant 0.000000e+00 : f32
    %61 = vector.broadcast %cst_35 : f32 to vector<1x64xf32>
    %62 = arith.subf %61, %60 : vector<1x64xf32>
    %c4_36 = arith.constant 4 : index
    %c0_37 = arith.constant 0 : index
    %63 = vector.load %arg6[%c4_36, %c0_37] : memref<8x64xf32, #tpu.memory_space<vmem>>, vector<1x64xf32>
    %cst_38 = arith.constant 1.000000e+01 : f32
    %64 = vector.broadcast %cst_38 : f32 to vector<1x64xf32>
    %65 = arith.mulf %64, %4 : vector<1x64xf32>
    %cst_39 = arith.constant 1.000000e+00 : f32
    %66 = vector.broadcast %cst_39 : f32 to vector<1x64xf32>
    %67 = arith.mulf %66, %11 : vector<1x64xf32>
    %68 = arith.addf %65, %67 : vector<1x64xf32>
    %69 = arith.mulf %62, %68 : vector<1x64xf32>
    %70 = arith.addf %63, %69 : vector<1x64xf32>
    %c4_40 = arith.constant 4 : index
    %c0_41 = arith.constant 0 : index
    %71 = vector.load %arg6[%c4_40, %c0_41] : memref<8x64xf32, #tpu.memory_space<vmem>>, vector<1x64xf32>
    tpu.vector_store %arg6[%c4_40, %c0_41], %70 {strides = array<i32>} : memref<8x64xf32, #tpu.memory_space<vmem>>, vector<1x64xf32>,
    %c5 = arith.constant 5 : index
    %c0_42 = arith.constant 0 : index
    %72 = vector.load %arg6[%c5, %c0_42] : memref<8x64xf32, #tpu.memory_space<vmem>>, vector<1x64xf32>
    %cst_43 = arith.constant 5.000000e-01 : f32
    %73 = vector.broadcast %cst_43 : f32 to vector<1x64xf32>
    %74 = arith.cmpf ogt, %45, %73 : vector<1x64xf32>
    %75 = arith.extui %74 : vector<1x64xi1> to vector<1x64xi32>
    %76 = arith.sitofp %75 : vector<1x64xi32> to vector<1x64xf32>
    %77 = arith.addf %72, %76 : vector<1x64xf32>
    %c5_44 = arith.constant 5 : index
    %c0_45 = arith.constant 0 : index
    %78 = vector.load %arg6[%c5_44, %c0_45] : memref<8x64xf32, #tpu.memory_space<vmem>>, vector<1x64xf32>
    tpu.vector_store %arg6[%c5_44, %c0_45], %77 {strides = array<i32>} : memref<8x64xf32, #tpu.memory_space<vmem>>, vector<1x64xf32>,
    %c0_46 = arith.constant 0 : index
    %c5_47 = arith.constant 5 : index
    %c0_48 = arith.constant 0 : index
    %79 = vector.load %arg2[%c0_46, %c5_47, %c0_48] : memref<1x8x64xf32, #tpu.memory_space<vmem>>, vector<1x3x64xf32>
    %80 = vector.shape_cast %79 : vector<1x3x64xf32> to vector<3x64xf32>
    %81 = arith.negf %80 : vector<3x64xf32>
    %82 = math.exp %81 : vector<3x64xf32>
    %cst_49 = arith.constant 1.000000e+00 : f32
    %83 = vector.broadcast %cst_49 : f32 to vector<3x64xf32>
    %84 = arith.addf %83, %82 : vector<3x64xf32>
    %85 = arith.divf %83, %84 : vector<3x64xf32>
    %c0_50 = arith.constant 0 : index
    %c5_51 = arith.constant 5 : index
    %c0_52 = arith.constant 0 : index
    %86 = vector.load %arg3[%c0_50, %c5_51, %c0_52] : memref<1x8x64xf32, #tpu.memory_space<vmem>>, vector<1x3x64xf32>
    %87 = vector.shape_cast %86 : vector<1x3x64xf32> to vector<3x64xf32>
    %88 = math.log %85 : vector<3x64xf32>
    %cst_53 = arith.constant -1.000000e+02 : f32
    %89 = vector.broadcast %cst_53 : f32 to vector<3x64xf32>
    %90 = arith.maximumf %88, %89 : vector<3x64xf32>
    %91 = arith.mulf %87, %90 : vector<3x64xf32>
    %cst_54 = arith.constant 1.000000e+00 : f32
    %92 = vector.broadcast %cst_54 : f32 to vector<3x64xf32>
    %93 = arith.subf %92, %87 : vector<3x64xf32>
    %cst_55 = arith.constant 1.000000e+00 : f32
    %94 = vector.broadcast %cst_55 : f32 to vector<3x64xf32>
    %95 = arith.subf %94, %85 : vector<3x64xf32>
    %96 = math.log %95 : vector<3x64xf32>
    %cst_56 = arith.constant -1.000000e+02 : f32
    %97 = vector.broadcast %cst_56 : f32 to vector<3x64xf32>
    %98 = arith.maximumf %96, %97 : vector<3x64xf32>
    %99 = arith.mulf %93, %98 : vector<3x64xf32>
    %100 = arith.addf %91, %99 : vector<3x64xf32>
    %cst_57 = arith.constant 0.000000e+00 : f32
    %101 = vector.broadcast %cst_57 : f32 to vector<3x64xf32>
    %102 = arith.subf %101, %100 : vector<3x64xf32>
    %c6 = arith.constant 6 : index
    %c0_58 = arith.constant 0 : index
    %103 = vector.load %arg6[%c6, %c0_58] : memref<8x64xf32, #tpu.memory_space<vmem>>, vector<1x64xf32>
    %104 = vector.broadcast %4 : vector<1x64xf32> to vector<3x64xf32>
    %105 = arith.mulf %102, %104 : vector<3x64xf32>
    %cst_59 = arith.constant dense<0.000000e+00> : vector<64xf32>
    %106 = vector.multi_reduction <add>, %105, %cst_59 [0] : vector<3x64xf32> to vector<64xf32>
    %107 = vector.shape_cast %106 : vector<64xf32> to vector<1x64xf32>
    %108 = arith.addf %103, %107 : vector<1x64xf32>
    %c6_60 = arith.constant 6 : index
    %c0_61 = arith.constant 0 : index
    %109 = vector.load %arg6[%c6_60, %c0_61] : memref<8x64xf32, #tpu.memory_space<vmem>>, vector<1x64xf32>
    tpu.vector_store %arg6[%c6_60, %c0_61], %108 {strides = array<i32>} : memref<8x64xf32, #tpu.memory_space<vmem>>, vector<1x64xf32>,
    %c1_i32 = arith.constant 1 : i32
    %110 = arith.cmpi eq, %arg1, %c1_i32 : i32
    %111 = arith.extui %110 : i1 to i32
    %c0_i32_62 = arith.constant 0 : i32
    %112 = arith.cmpi ne, %111, %c0_i32_62 : i32
    scf.if %112 {
      %c0_63 = arith.constant 0 : index
      %c0_64 = arith.constant 0 : index
      %113 = vector.load %arg6[%c0_63, %c0_64] : memref<8x64xf32, #tpu.memory_space<vmem>>, vector<8x64xf32>
      %cst_65 = arith.constant dense<0.000000e+00> : vector<8xf32>
      %114 = vector.multi_reduction <add>, %113, %cst_65 [1] : vector<8x64xf32> to vector<8xf32>
      %115 = vector.shape_cast %114 : vector<8xf32> to vector<8x1xf32>
      %116 = vector.shape_cast %115 : vector<8x1xf32> to vector<1x8x1xf32>
      %117 = vector.shape_cast %116 : vector<1x8x1xf32> to vector<1x8x1xf32>
      %118 = vector.broadcast %117 : vector<1x8x1xf32> to vector<1x8x128xf32>
      %c0_66 = arith.constant 0 : index
      %c0_67 = arith.constant 0 : index
      %c0_68 = arith.constant 0 : index
      %119 = vector.load %arg5[%c0_66, %c0_67, %c0_68] : memref<1x8x128xf32, #tpu.memory_space<vmem>>, vector<1x8x128xf32>
      tpu.vector_store %arg5[%c0_66, %c0_67, %c0_68], %118 {strides = array<i32>} : memref<1x8x128xf32, #tpu.memory_space<vmem>>, vector<1x8x128xf32>,
    } else {
    }
    return
  }
  func.func @transform_0(%arg0: i32, %arg1: i32) -> (i32, i32, i32) {
    %c2_i32 = arith.constant 2 : i32
    %0 = arith.muli %arg0, %c2_i32 : i32
    %1 = arith.addi %0, %arg1 : i32
    %c0_i32 = arith.constant 0 : i32
    %c0_i32_0 = arith.constant 0 : i32
    %c0_i32_1 = arith.constant 0 : i32
    return %1, %c0_i32, %c0_i32_0 : i32, i32, i32
  }
  func.func @transform_1(%arg0: i32, %arg1: i32) -> (i32, i32, i32) {
    %c2_i32 = arith.constant 2 : i32
    %0 = arith.muli %arg0, %c2_i32 : i32
    %1 = arith.addi %0, %arg1 : i32
    %c0_i32 = arith.constant 0 : i32
    %c0_i32_0 = arith.constant 0 : i32
    %c0_i32_1 = arith.constant 0 : i32
    return %1, %c0_i32, %c0_i32_0 : i32, i32, i32
  }
  func.func @transform_2(%arg0: i32, %arg1: i32) -> (i32, i32, i32) {
    %c2_i32 = arith.constant 2 : i32
    %0 = arith.muli %arg0, %c2_i32 : i32
    %1 = arith.addi %0, %arg1 : i32
    %c0_i32 = arith.constant 0 : i32
    %c0_i32_0 = arith.constant 0 : i32
    %c0_i32_1 = arith.constant 0 : i32
    return %1, %c0_i32, %c0_i32_0 : i32, i32, i32
  }
  func.func @transform_3(%arg0: i32, %arg1: i32) -> (i32, i32, i32) {
    %c0_i32 = arith.constant 0 : i32
    %c0_i32_0 = arith.constant 0 : i32
    %c0_i32_1 = arith.constant 0 : i32
    return %arg0, %c0_i32, %c0_i32_0 : i32, i32, i32
  }
}

</mosaic_0001>

<bundles_post_ra>
// kernel: tpu_custom_call.1
= control target key start
LH: loop header
LB: loop body
LE: loop exit
PB: predicated region body
PF: predicated region fallthrough
CT: control target
= control target key end

     0   :  { %s1229_s0 = inlined_call_operand.hbm [shape: f32[4,8,64], index: 0, kind: input, shape index: {}]   ;;  %s1230_s1 = inlined_call_operand.hbm [shape: f32[4,8,64], index: 1, kind: input, shape index: {}]   ;;  %s1231_s2 = inlined_call_operand.hbm [shape: f32[4,2,64], index: 2, kind: input, shape index: {}]   ;;  %s1232_s3 = inlined_call_operand.hbm [shape: f32[2,8,128], index: 3, kind: output, shape index: {}]  }
   0x1   :  { %1239 = sst [smem:[#allocation21_spill]] %s1230_s1 }
   0x2   :  { %8 = vsyncpa [#allocation4], 0 }
   0x3   :  { %10 = vsyncpa [#allocation4 + $0x1], 0 }
   0x4   :  { %11 = vsyncpa [#allocation7], 0 }
   0x5   :  { %13 = vsyncpa [#allocation7 + $0x1], 0 }
   0x6   :  { %14 = vsyncpa [#allocation5], 0 }
   0x7   :  { %16 = vsyncpa [#allocation5 + $0x1], 0  ;;  %s955_s12 = smov 0   ;;  %s957_s13 = smov 0  }
   0x8   :  { %s959_s14 = smov 0   ;;  %s961_s15 = smov 0  }
   0x9   :  { %s963_s16 = smov 0   ;;  %s965_s17 = smov 0  }
   0xa   :  { %s967_s18 = smov 0   ;;  %s969_s19 = smov 0  }
   0xb   :  { %s971_s20 = smov 0   ;;  %s973_s21 = smov 0  }
   0xc   :  { %s975_s22 = smov 0  }
   0xd LB: > { %1240 = sst [smem:[#allocation13_spill]] %s895_s14  ;;  %s1009_s23 = sadd.s32 4294967295, %s927_s22   ;;  %s927_s22 = sphi %s975_s22, %s22_s22   ;;  %s923_s21 = sphi %s973_s21, %s1262_s21   ;;  %s919_s20 = sphi %s971_s20, %s1261_s20   ;;  %s915_s19 = sphi %s969_s19, %s1260_s19   ;;  %s911_s18 = sphi %s967_s18, %s1259_s18   ;;  %s907_s17 = sphi %s965_s17, %s1258_s17   ;;  %s903_s16 = sphi %s963_s16, %s1266_s16   ;;  %s899_s15 = sphi %s961_s15, %s1265_s15   ;;  %s895_s14 = sphi %s959_s14, %s1256_s14   ;;  %s891_s13 = sphi %s957_s13, %s1264_s13   ;;  %s887_s12 = sphi %s955_s12, %s1263_s12  }
   0xe   : > { %1241 = sst [smem:[#allocation14_spill]] %s907_s17  ;;  %s552_s24 = sadd.s32 4294967294, %s927_s22  }
   0xf   : > { %1242 = sst [smem:[#allocation15_spill]] %s919_s20  ;;  %s31_s25 = sadd.s32 1, %s919_s20 }
  0x10   : > { %1243 = sst [smem:[#allocation16_spill]] %s923_s21  ;;  %s34_s26 = sadd.s32 1, %s923_s21 }
  0x11   : > { %p32_p0 = scmp.ge.s32.totalorder %s31_s25, 2  ;;  %s553_s27 = sshll.u32 %s923_s21, 1 }
  0x12   : > { %s1016_s28 = sadd.s32 %s919_s20, %s553_s27  ;;  %s45_s29 = sadd.s32 1, %s907_s17 }
  0x13   : > { %s1268_s25 = smov (%p32_p0, %s31_s25), 0  ;;  %s1270_s26 = smov (!%p32_p0, %s34_s26), %s923_s21 }
  0x14   : > { %1244 = sst [smem:[#allocation17_spill]] %s1268_s25  ;;  %p52_p1 = scmp.ne.s32.totalorder %s907_s17, %s903_s16 }
  0x15   : > { %p53_p2 = scmp.eq.s32.totalorder %s927_s22, 0  ;;  %p36_p3 = scmp.ge.s32.totalorder %s1270_s26, 2 }
  0x16   : > { %p58_p4 = scmp.ne.s32.totalorder %s903_s16, %s899_s15  ;;  %p59_p6 = scmp.eq.s32.totalorder %s1009_s23, 0 }
  0x17   : > { %p1026_p5 = por %p53_p2, %p52_p1  ;;  %s1272_s26 = smov (%p36_p3, %s1270_s26), 0 }
  0x18   : > { %1246 = sst [smem:[#allocation18_spill]] %s1272_s26  ;;  %p1033_p7 = por %p59_p6, %p58_p4 }
  0x19   : > { %s131_s5 = sadd.s32 1, %s895_s14  ;;  %s554_s6 = sshll.u32 %s1272_s26, 1 }
  0x1a   : > { %s128_s7 = ssub.s32 %s923_s21, %s1272_s26  ;;  %s41_s8 = sadd.s32 %s554_s6, %s1268_s25 }
  0x1b   : > { %p129_p8 = scmp.eq.s32.totalorder %s128_s7, 0  ;;  %s42_s9 = ssub.s32 %s1016_s28, %s41_s8 }
  0x1c   : > { %p141_p9 = scmp.ne.s32.totalorder %s895_s14, %s891_s13  ;;  %p43_p10 = scmp.eq.s32.totalorder %s42_s9, 0 }
  0x1d   : > { %p142_p11 = scmp.eq.s32.totalorder %s1009_s23, 3  ;;  %p147_p13 = scmp.ne.s32.totalorder %s891_s13, %s887_s12 }
  0x1e   : > { %s1047_s10 = scalar_select %p129_p8, %s895_s14, %s131_s5  }
  0x1f   : > { %s1050_s11 = scalar_select %p43_p10, %s907_s17, %s45_s29  }
  0x20   : > { %1248 = sst [smem:[#allocation19_spill]] %s1047_s10  ;;  %p1052_p12 = por %p142_p11, %p141_p9 }
  0x21   : > { %1249 = sst [smem:[#allocation20_spill]] %s1050_s11  ;;  %p148_p0 = scmp.eq.s32.totalorder %s552_s24, 3 }
  0x22   : > { %p607_p1 = scmp.lt.s32.totalorder %s927_s22, 4  ;;  %s1062_s27 = sand.u32 1, %s907_s17  }
  0x23   : > { %p1064_p2 = por %p148_p0, %p147_p13  ;;  %s561_s5 = sshll.u32 %s1062_s27, 3 }
  0x24   : > { %s563_s7 = sshll.u32 %s1016_s28, 7  ;;  %p1072_p3 = pnand %p607_p1, %p1026_p5 }
  0x25   : > { %s188_s8 = sand.u32 1, %s927_s22   ;;  %s1253_s1 = sld [smem:[#allocation21_spill]] }
  0x26   : > { %s192_s25 = scalar_lea.vmem [#allocation6], %s561_s5  ;;  %p570_p4 = scmp.ge.s32.totalorder %s927_s22, 1 }
  0x27   : > { %s201_s21 = sshll.u32 %s192_s25, 4  ;;  %s1081_s20 = scalar_lea.sflag [#allocation7], %s188_s8  ;;  %s202_s21 = int_to_ptr.vmem [resolvable:$true] %s201_s21 }
  0x28   : > { %p721_p6 = pneg %p1072_p3  ;;  %s732_s30 = scalar_lea.vmem %s202_s21, 128 }
  0x29   : > { %p733_p5 = scmp.ne.s32.totalorder %s202_s21, %s732_s30  ;;  %s929_s11 = smov [#allocation6]  }
  0x2a   : > { %s737_s17 = sshll.u32 %s929_s11, 4  ;;  %s738_s17 = int_to_ptr.vmem [resolvable:$false] %s737_s17 }
  0x2b   : > { %s199_s26 = scalar_lea.hbm %s1253_s1, %s563_s7  ;;  %p735_p8 = pnand %p733_p5, %p721_p6 }
  0x2c   : > { %s739_s10 = scalar_lea.vmem %s738_s17, 256  ;;  %p740_p10 = scmp.lt.s32.totalorder %s202_s21, %s738_s17 }
  0x2d   : > { %p736_p9 = pneg %p735_p8  ;;  %p741_p11 = scmp.lt.s32.totalorder %s739_s10, %s732_s30 }
  0x2f   : > { %p742_p13 = por %p741_p11, %p740_p10 }
  0x31   : > { %p743_p0 = pnand %p742_p13, %p736_p9 }
  0x33   : > { %746 = shalt.err (!%p743_p0)
}
  0x34   : > { %599 = dma.hbm_to_vmem [thread:$0]  (!%p1072_p3), %s199_s26, 128, %s202_s21, %s1081_s20  }
  0x35   : > { %p226_p1 = scmp.lt.s32.totalorder %s927_s22, 5  ;;  %s179_s11 = scalar_lea.hbm %s1229_s0, %s563_s7 }
  0x36   : > { %s172_s8 = scalar_lea.vmem [#allocation3], %s561_s5  ;;  %s567_s24 = sshll.u32 %s1062_s27, 1 }
  0x37   : > { %p1094_p5 = pnand %p570_p4, %p226_p1  ;;  %s181_s9 = sshll.u32 %s172_s8, 4  ;;  %s182_s9 = int_to_ptr.vmem [resolvable:$true] %s181_s9 }
  0x38   : > { %s169_s30 = scalar_lea.sflag [#allocation4], %s1062_s27  ;;  %s760_s1 = scalar_lea.vmem %s182_s9, 128 }
  0x39   : > { %p761_p8 = scmp.ne.s32.totalorder %s182_s9, %s760_s1  ;;  %s930_s21 = smov [#allocation3]  }
  0x3a   : > { %s765_s26 = sshll.u32 %s930_s21, 4  ;;  %s766_s26 = int_to_ptr.vmem [resolvable:$false] %s765_s26 }
  0x3b   : > { %p763_p9 = pnand %p761_p8, %p721_p6  ;;  %s767_s14 = scalar_lea.vmem %s766_s26, 256 }
  0x3c   : > { %p768_p4 = scmp.lt.s32.totalorder %s182_s9, %s766_s26  ;;  %p769_p11 = scmp.lt.s32.totalorder %s767_s14, %s760_s1 }
  0x3d   : > { %p764_p10 = pneg %p763_p9 }
  0x3e   : > { %p770_p13 = por %p769_p11, %p768_p4 }
  0x40   : > { %p771_p0 = pnand %p770_p13, %p764_p10 }
  0x42   : > { %774 = shalt.err (!%p771_p0)
}
  0x43   : > { %596 = dma.hbm_to_vmem [thread:$0]  (!%p1072_p3), %s179_s11, 128, %s182_s9, %s169_s30  }
  0x44   : > { %s569_s27 = sshll.u32 %s1016_s28, 5  ;;  %s212_s10 = scalar_lea.vmem [#allocation8], %s567_s24 }
  0x45   : > { %s219_s17 = scalar_lea.hbm %s1231_s2, %s569_s27  ;;  %s221_s8 = sshll.u32 %s212_s10, 4  ;;  %s222_s8 = int_to_ptr.vmem [resolvable:$true] %s221_s8 }
  0x46   : > { %s788_s21 = scalar_lea.vmem %s222_s8, 32  ;;  %s931_s1 = smov [#allocation8]  }
  0x47   : > { %p789_p1 = scmp.ne.s32.totalorder %s222_s8, %s788_s21  ;;  %s793_s14 = sshll.u32 %s931_s1, 4  ;;  %s794_s14 = int_to_ptr.vmem [resolvable:$false] %s793_s14 }
  0x48   : > { %s795_s26 = scalar_lea.vmem %s794_s14, 64  ;;  %p796_p10 = scmp.lt.s32.totalorder %s222_s8, %s794_s14 }
  0x49   : > { %p791_p8 = pnand %p789_p1, %p721_p6  ;;  %p797_p4 = scmp.lt.s32.totalorder %s795_s26, %s788_s21 }
  0x4b   : > { %p792_p9 = pneg %p791_p8  ;;  %p798_p11 = por %p797_p4, %p796_p10 }
  0x4d   : > { %p799_p13 = pnand %p798_p11, %p792_p9 }
  0x4f   : > { %802 = shalt.err (!%p799_p13)
}
  0x50   : > { %602 = dma.hbm_to_vmem [thread:$0]  (!%p1072_p3), %s219_s17, 32, %s222_s8, %s1081_s20  }
  0x51   : > { %230 = sbr.rel (%p1094_p5) target bundleno = 351 (0x15f), region = 32  ;;  %s232_s28 = sand.u32 (!%p1094_p5), 1, %s903_s16  }
  0x52   : > { %s571_s11 = sshll.u32 (!%p1094_p5), %s232_s28, 3  ;;  %s233_s9 = scalar_lea.sflag (!%p1094_p5), [#allocation4], %s232_s28 }
  0x53   : > { %s1121_s24 = scalar_lea.vmem (!%p1094_p5), [#allocation3], %s571_s11 }
  0x56   : > { %874 = dma.done.wait (%p1033_p7), %s233_s9, 128  }
  0x57   : > { %876 = vsyncadd (%p1033_p7), %s233_s9, 4294967168  ;;  %s241_s29 = sand.u32 1, %s1009_s23   ;;  %s1128_s20 = scalar_lea.vmem [#allocation6], %s571_s11 }
  0x58   : > { %s242_s30 = scalar_lea.sflag [#allocation7], %s241_s29 }
  0x59   : > { %878 = dma.done.wait (%p1033_p7), %s242_s30, 160  }
  0x5a   : > { %880 = vsyncadd (%p1033_p7), %s242_s30, 4294967136  ;;  %s573_s25 = sshll.u32 %s232_s28, 1  ;;  %s284_s27 = sand.u32 1, %s891_s13  }
  0x5b   : > { %s1137_s5 = sshll.u32 %s284_s27, 3  ;;  %s1139_s7 = scalar_lea.vmem [#allocation8], %s573_s25 }
  0x5c   : > { %s286_s17 = scalar_lea.vmem [#allocation9], %s1137_s5  ;;  %p575_p3 = scmp.ne.s32.totalorder %s911_s18, 0 }
  0x5e   : > { %296 = sbr.rel (%p575_p3) target bundleno = 101 (0x65), region = 48 }
  0x63   : > { %vm297_vm0 = vcmask 523264   ;;  %v932_v0 = vmov 0.0  }
  0x64   : > { %298 = vst.msk [vmem:[#allocation2] sm:$0xff] %vm297_vm0, %v932_v0 }
  0x65 PF: > { %v305_v1 = vld [vmem:[%s1121_s24] sm:$0x3]  ;;  %v316_v2 = vlaneseq  ;;  %v324_v5 = vld [vmem:[%s1121_s24 + $0x2] sm:$0x3]  ;;  %v325_v6 = vld [vmem:[%s1128_s20 + $0x2] sm:$0x3] }
  0x66   : > { %v576_v3 = vmul.f32 -1.442695, %v305_v1  ;;  %v1147_v7 = vld [vmem:[%s1139_s7] sm:$0x1]  ;;  %v326_v8 = vsub.f32 %v324_v5, %v325_v6  ;;  %v332_v9 = vld [vmem:[%s1121_s24 + $0x4] sm:$0x1] }
  0x67   : > { %v317_v4 = vshrl.u32 %v316_v2, 7  ;;  %v577_v11 = vmul.f32 -1.442695, %v332_v9  ;;  %v365_v14 = vld [vmem:[%s1121_s24 + $0x5] sm:$0x7]  ;;  %vm322_vm1 = vcmask 517120  }
  0x68   : > { %699 = vpow2.f32 %v576_v3  ;;  %v328_v12 = vmul.f32 %v326_v8, %v326_v8  ;;  %v579_v16 = vmul.f32 -1.442695, %v365_v14  ;;  %v312_v25 = vld [vmem:[%s1128_s20] sm:$0x3]  ;;  %vm357_vm3 = vcmask 516096   ;;  %p580_p7 = scmp.ne.s32.totalorder %s911_s18, 1 }
  0x69   : > { %v318_v10 = vsub.s32 0, %v317_v4  ;;  %701 = vpow2.f32 %v577_v11  ;;  %v933_v34 = vmov 0.0   ;;  %v300_v40 = vld [vmem:[%s1139_s7 + $0x1] sm:$0x1]  ;;  %v339_v43 = vld [vmem:[%s1128_s20 + $0x4] sm:$0x1] }
  0x6a   : > { %703 = vpow2.f32 %v579_v16  ;;  %v302_v41 = vmul.f32 2.0, %v300_v40  ;;  %v301_v44 = vadd.f32 %v300_v40, %v1147_v7  ;;  %v344_v50 = vsub.f32 1.0, %v339_v43  ;;  %v372_v52 = vld [vmem:[%s1128_s20 + $0x5] sm:$0x7] }
  0x6b   : > { %v1151_v13 = vrot.slane %v1147_v7, %v318_v10  ;;  %v327_v15 = vld [vmem:[#allocation2 + $0x2] sm:$0x3]  ;;  %v359_v30 = vld [vmem:[#allocation2 + $0x5] sm:$0x1]  ;;  %v314_v31 = vld [vmem:[#allocation2] sm:$0x3] }
  0x6c   : > { %v303_v45 = vmul.f32 %v302_v41, %v1147_v7  ;;  %v353_v58 = vmul.f32 10.0, %v1147_v7  ;;  %v377_v60 = vsub.f32 1.0, %v372_v52  ;;  %v352_v5 = vld [vmem:[#allocation2 + $0x4] sm:$0x1]  ;;  %vm387_vm4 = vcmask 518144  }
  0x6d   : > { %v329_v17 = vmul.f32 %v328_v12, %v1151_v13 }
  0x6e   : > { %v304_v55 = vsub.f32 %v301_v44, %v303_v45 }
  0x6f   : > { %v330_v18 = vadd.f32 %v329_v17, %v327_v15 }
  0x70   : > { %v354_v2 = vadd.f32 %v353_v58, %v304_v55 }
  0x71   : > { %331 = vst.msk [vmem:[#allocation2 + $0x2] sm:$0x3] %vm322_vm1, %v330_v18  ;;  %v385_v18 = vld [vmem:[#allocation2 + $0x6] sm:$0x1] }
  0x75   : > { %v700_v19 = vpop.eup %699 }
  0x76   : > { %v309_v20 = vadd.f32 1.0, %v700_v19  ;;  %v702_v21 = vpop.eup %701 }
  0x77   : > { %v336_v22 = vadd.f32 1.0, %v702_v21  ;;  %v704_v23 = vpop.eup %703 }
  0x78   : > { %705 = vrcp.f32 %v309_v20  ;;  %v369_v24 = vadd.f32 1.0, %v704_v23 }
  0x79   : > { %707 = vrcp.f32 %v336_v22 }
  0x7a   : > { %709 = vrcp.f32 %v369_v24 }
  0x85   : > { %v706_v26 = vpop.eup %705 }
  0x86   : > { %v313_v27 = vsub.f32 %v706_v26, %v312_v25  ;;  %v708_v28 = vpop.eup %707 }
  0x87   : > { %711 = vlog2.f32 %v708_v28  ;;  %v345_v32 = vsub.f32 1.0, %v708_v28  ;;  %vm360_vm2 = vcmp.gt.f32.partialorder %v708_v28, 0.5  ;;  %v710_v36 = vpop.eup %709 }
  0x88   : > { %v315_v29 = vmul.f32 %v313_v27, %v313_v27  ;;  %v578_v35 = vsel %vm360_vm2, 1.0, %v933_v34  ;;  %v378_v39 = vsub.f32 1.0, %v710_v36 }
  0x89   : > { %713 = vlog2.f32 %v345_v32  ;;  %v363_v37 = vadd.f32 %v578_v35, %v359_v30 }
  0x8a   : > { %v320_v33 = vmul.f32 %v1151_v13, %v315_v29  ;;  %715 = vlog2.f32 %v710_v36 }
  0x8b   : > { %364 = vst.msk [vmem:[#allocation2 + $0x5] sm:$0x1] %vm357_vm3, %v363_v37  ;;  %717 = vlog2.f32 %v378_v39 }
  0x8c   : > { %v321_v38 = vadd.f32 %v320_v33, %v314_v31 }
  0x8e   : > { %323 = vst.msk [vmem:[#allocation2] sm:$0x3] %vm322_vm1, %v321_v38 }
  0x94   : > { %v712_v42 = vpop.eup %711 }
  0x95   : > { %v341_v46 = vmul.f32 0.6931472, %v712_v42 }
  0x96   : > { %v714_v47 = vpop.eup %713 }
  0x97   : > { %v716_v48 = vpop.eup %715  ;;  %v342_v49 = vmax.f32 %v341_v46, -100.0  ;;  %v347_v51 = vmul.f32 0.6931472, %v714_v47 }
  0x98   : > { %v374_v53 = vmul.f32 0.6931472, %v716_v48  ;;  %v718_v54 = vpop.eup %717 }
  0x99   : > { %v343_v56 = vmul.f32 %v342_v49, %v339_v43  ;;  %v348_v57 = vmax.f32 %v347_v51, -100.0  ;;  %v380_v61 = vmul.f32 0.6931472, %v718_v54 }
  0x9a   : > { %v375_v59 = vmax.f32 %v374_v53, -100.0 }
  0x9b   : > { %v349_v62 = vmul.f32 %v348_v57, %v344_v50  ;;  %v381_v0 = vmax.f32 %v380_v61, -100.0 }
  0x9c   : > { %v376_v63 = vmul.f32 %v375_v59, %v372_v52 }
  0x9d   : > { %v350_v1 = vadd.f32 %v349_v62, %v343_v56  ;;  %v382_v3 = vmul.f32 %v381_v0, %v377_v60 }
  0x9f   : > { %v351_v4 = vsub.f32 0.0, %v350_v1  ;;  %v383_v6 = vadd.f32 %v382_v3, %v376_v63 }
  0xa1   : > { %v355_v8 = vmul.f32 %v354_v2, %v351_v4  ;;  %v384_v9 = vsub.f32 0.0, %v383_v6 }
  0xa3   : > { %v356_v10 = vadd.f32 %v355_v8, %v352_v5  ;;  %v386_v11 = vmul.f32 %v384_v9, %v1151_v13 }
  0xa5   : > { %358 = vst.msk [vmem:[#allocation2 + $0x4] sm:$0x1] %vm357_vm3, %v356_v10  ;;  %v388_v7 = vsel %vm387_vm4, %v386_v11, 0.0 }
  0xa6   : > { %v389_v12 = vrot.slane %v388_v7, 4 }
  0xa8   : > { %v390_v14 = vadd.f32 %v389_v12, %v388_v7 }
  0xaa   : > { %v391_v15 = vrot.slane %v390_v14, 2 }
  0xac   : > { %v392_v16 = vadd.f32 %v391_v15, %v390_v14 }
  0xae   : > { %v393_v17 = vrot.slane %v392_v16, 1 }
  0xb0   : > { %v394_v19 = vadd.f32 %v393_v17, %v392_v16  ;;  %400 = sbr.rel (%p580_p7) target bundleno = 328 (0x148), region = 52 }
  0xb2   : > { %v395_v20 = vadd.f32 %v394_v19, %v385_v18 }
  0xb4   : > { %396 = vst.msk [vmem:[#allocation2 + $0x6] sm:$0x1] %vm357_vm3, %v395_v20 }
  0xb5   : > { %vm402_vm5 = vcmask 523264  }
  0xbb   : > { %v401_v21 = vld [vmem:[#allocation2] sm:$0xff] }
  0xbc   : > { %v403_v13 = vsel %vm402_vm5, %v401_v21, 0.0 }
  0xbd   : > { %404 = vadd.xlane.f32.xlu0 %v403_v13 }
 0x146   : > { %v405_v22 = vpop.xlane.xlu0 %404 }
 0x147   : > { %406 = vst [vmem:[%s286_s17] sm:$0xff] %v405_v22 }
 0x148 PF: > { %s582_s23 = sshll.u32 %s915_s19, 7  ;;  %s421_s18 = sshll.u32 %s286_s17, 4  ;;  %s422_s18 = int_to_ptr.vmem [resolvable:$true] %s421_s18 }
 0x149   : > { %s419_s8 = scalar_lea.hbm %s1232_s3, %s582_s23  ;;  %s408_s21 = scalar_lea.sflag [#allocation5], %s284_s27 }
 0x14a   : > { %s803_s1 = scalar_lea.vmem %s422_s18, 128  ;;  %s934_s14 = smov [#allocation9]  }
 0x14b   : > { %p804_p6 = scmp.ne.s32.totalorder %s422_s18, %s803_s1  ;;  %s807_s26 = sshll.u32 %s934_s14, 4  ;;  %s808_s26 = int_to_ptr.vmem [resolvable:$false] %s807_s26 }
 0x14c   : > { %s809_s28 = scalar_lea.vmem %s808_s26, 256  ;;  %p810_p1 = scmp.lt.s32.totalorder %s422_s18, %s808_s26 }
 0x14d   : > { %p805_p5 = pnand %p804_p6, %p1052_p12  ;;  %p811_p8 = scmp.lt.s32.totalorder %s809_s28, %s803_s1 }
 0x14f   : > { %p806_p0 = pneg %p805_p5  ;;  %p812_p9 = por %p811_p8, %p810_p1 }
 0x151   : > { %p813_p10 = pnand %p812_p9, %p806_p0 }
 0x153   : > { %816 = shalt.err (!%p813_p10)
}
 0x154   : > { %s817_s19 = scalar_lea.hbm %s419_s8, 128  ;;  %s821_s24 = scalar_lea.hbm %s1232_s3, 256 }
 0x155   : > { %p818_p4 = scmp.ne.s32.totalorder %s419_s8, %s817_s19  ;;  %p822_p3 = scmp.lt.s32.totalorder %s419_s8, %s1232_s3 }
 0x156   : > { %p823_p7 = scmp.lt.s32.totalorder %s821_s24, %s817_s19 }
 0x157   : > { %p819_p11 = pnand %p818_p4, %p1052_p12 }
 0x158   : > { %p824_p6 = por %p823_p7, %p822_p3 }
 0x159   : > { %p820_p13 = pneg %p819_p11 }
 0x15b   : > { %p825_p5 = pnand %p824_p6, %p820_p13 }
 0x15d   : > { %828 = shalt.err (!%p825_p5)
}
 0x15e   : > { %591 = dma.vmem_to_hbm [thread:$0]  (%p1052_p12), %s422_s18, 128, %s419_s8, %s408_s21  }
 0x15f PF: > { %p608_p0 = scmp.ge.s32.totalorder %s927_s22, 2  ;;  %s433_s20 = sand.u32 1, %s887_s12  }
 0x160   : > { %s434_s25 = scalar_lea.sflag [#allocation5], %s433_s20 }
 0x161   : > { %p604_p1 = pnand %p608_p0, %p1064_p2 }
 0x163   : > { %p605_p8 = pneg %p604_p1 }
 0x165   : > { %882 = dma.done.wait (%p605_p8), %s434_s25, 128  }
 0x166   : > { %884 = vsyncadd (%p605_p8), %s434_s25, 4294967168  ;;  %s22_s22 = sadd.s32 1, %s927_s22   ;;  %s1255_s27 = sld [smem:[#allocation13_spill]] }
 0x167   : > { %p19_p9 = scmp.ge.s32.totalorder %s22_s22, 6   ;;  %s1256_s14 = sld [smem:[#allocation19_spill]] }
 0x168   : > { %s1257_s5 = sld [smem:[#allocation14_spill]]  ;;  %s1263_s12 = smov %s891_s13 }
 0x169   : > { %s1258_s17 = sld [smem:[#allocation20_spill]]  ;;  %s1265_s15 = smov %s903_s16 }
 0x16a   : > { %s1259_s18 = sld [smem:[#allocation15_spill]]  ;;  %21 = sbr.rel (!%p19_p9) target bundleno = 13 (0xd), region = 109 }
 0x16b   : > { %s1260_s19 = sld [smem:[#allocation16_spill]] }
 0x16c   : > { %s1261_s20 = sld [smem:[#allocation17_spill]]  ;;  %s1264_s13 = smov %s1255_s27 }
 0x16d   : > { %s1262_s21 = sld [smem:[#allocation18_spill]] }
 0x16e   : > { %s1266_s16 = smov %s1257_s5 }
 0x16f   :  { %439 = vsyncpa [#allocation4], 1 }
 0x170   :  { %441 = vsyncpa [#allocation4 + $0x1], 1 }
 0x171   :  { %442 = vsyncpa [#allocation7], 1 }
 0x172   :  { %444 = vsyncpa [#allocation7 + $0x1], 1 }
 0x173   :  { %445 = vsyncpa [#allocation5], 1 }
 0x174   :  { %447 = vsyncpa [#allocation5 + $0x1], 1 }

</bundles_post_ra>
